<compile_context>
chip_gen: v6e
topology: v6e:2x2x1
jax: 0.10.0
libtpu: 0.0.40
codegen_flags: <defaults>
</compile_context>

<pallas_src>
import math
from functools import partial

import jax
import jax.numpy as jnp
from jax.experimental import pallas as pl
from jax.experimental.pallas import tpu as pltpu


def _round_up(x, m):
    return (x + m - 1) // m * m


# --------------------------------------------------------------------------
# Fused Pallas kernel: GRU cell + fc_out for one batch-row tile
# --------------------------------------------------------------------------

def _decoder_step_kernel(e_ref, c_ref, h_ref,
                         wih_e_ref, wih_c_ref, whh_ref, bih_ref, bhh_ref,
                         wout_e_ref, wout_h_ref, wout_c_ref, bout_ref,
                         pred_ref, hnew_ref, *, d_model):
    D = d_model
    e = e_ref[...]          # (bm, D)  embedded tokens
    c = c_ref[...]          # (bm, D)  context
    h = h_ref[...]          # (bm, D)  previous hidden

    # GRU input / hidden pre-activations, PyTorch gate order [r | z | n] along 3D.
    # emb_con = cat([e, c]) @ W_ih^T  is computed as two partial matmuls so the
    # concatenation never materializes.
    gi = (jnp.dot(e, wih_e_ref[...], preferred_element_type=jnp.float32)
          + jnp.dot(c, wih_c_ref[...], preferred_element_type=jnp.float32)
          + bih_ref[...])                                       # (bm, 3D)
    gh = (jnp.dot(h, whh_ref[...], preferred_element_type=jnp.float32)
          + bhh_ref[...])                                       # (bm, 3D)

    r = jax.nn.sigmoid(gi[:, 0:D] + gh[:, 0:D])
    z = jax.nn.sigmoid(gi[:, D:2 * D] + gh[:, D:2 * D])
    n = jnp.tanh(gi[:, 2 * D:3 * D] + r * gh[:, 2 * D:3 * D])
    h_new = (1.0 - z) * n + z * h                               # (bm, D)
    hnew_ref[...] = h_new

    # fc_out over cat([embedded, hidden_new, context]) == sum of three partial matmuls.
    pred_ref[...] = (jnp.dot(e, wout_e_ref[...], preferred_element_type=jnp.float32)
                     + jnp.dot(h_new, wout_h_ref[...], preferred_element_type=jnp.float32)
                     + jnp.dot(c, wout_c_ref[...], preferred_element_type=jnp.float32)
                     + bout_ref[...])                           # (bm, V)


# --------------------------------------------------------------------------
# Wrapper: parameter pre-splitting, batch tiling, pallas_call
# --------------------------------------------------------------------------

def decoder_rnn_step(params, input_ids, hidden, context):
    """One decode step of DecoderRNN ('rnn_naive_model').

    input_ids: (B,)   int32 token ids
    hidden   : (1, B, D) float32
    context  : (1, B, D) float32
    returns (prediction (B, V), hidden (1, B, D))
    """
    D = params["d_model"]
    V = params["output_size"]
    B = int(input_ids.shape[0])

    # Embedding lookup (nn.Embedding) — gather, done as glue outside the kernel.
    embedded = jnp.take(params["embedding"], input_ids, axis=0)   # (B, D)
    h0 = hidden[0]
    c0 = context[0]

    # Pre-transpose / pre-split weights once (host-side, outside the kernel).
    w_ih_t = params["w_ih"].T              # (2D, 3D)
    wih_e = w_ih_t[:D]                     # rows multiplying `embedded`
    wih_c = w_ih_t[D:]                     # rows multiplying `context`
    whh = params["w_hh"].T                 # (D, 3D)
    b_ih = params["b_ih"].reshape(1, 3 * D)
    b_hh = params["b_hh"].reshape(1, 3 * D)
    w_out_t = params["w_out"].T            # (3D, V), concat order [e | h_new | c]
    wout_e = w_out_t[0:D]
    wout_h = w_out_t[D:2 * D]
    wout_c = w_out_t[2 * D:3 * D]
    b_out = params["b_out"].reshape(1, V)

    # Row (batch) tiling: whole batch in one block when tiny, otherwise 128-row
    # tiles (padded) so the grid pipelines and shards across TensorCores (v7x).
    if B <= 8:
        bm, Bp = B, B
    else:
        bm = 128
        Bp = _round_up(B, bm)
    if Bp != B:
        pad = ((0, Bp - B), (0, 0))
        embedded = jnp.pad(embedded, pad)
        h0 = jnp.pad(h0, pad)
        c0 = jnp.pad(c0, pad)
    grid = (Bp // bm,)

    def row_spec(d):
        return pl.BlockSpec((bm, d), lambda i: (i, 0))

    def full_spec(shape):
        return pl.BlockSpec(shape, lambda i: (0, 0))

    pred, h_new = pl.pallas_call(
        partial(_decoder_step_kernel, d_model=D),
        grid=grid,
        in_specs=[
            row_spec(D), row_spec(D), row_spec(D),                    # e, c, h
            full_spec((D, 3 * D)), full_spec((D, 3 * D)),             # wih_e, wih_c
            full_spec((D, 3 * D)),                                    # whh
            full_spec((1, 3 * D)), full_spec((1, 3 * D)),             # b_ih, b_hh
            full_spec((D, V)), full_spec((D, V)), full_spec((D, V)),  # wout_e/h/c
            full_spec((1, V)),                                        # b_out
        ],
        out_specs=[row_spec(V), row_spec(D)],
        out_shape=[
            jax.ShapeDtypeStruct((Bp, V), jnp.float32),
            jax.ShapeDtypeStruct((Bp, D), jnp.float32),
        ],
        compiler_params=pltpu.CompilerParams(
            dimension_semantics=("parallel",),
            vmem_limit_bytes=64 * 1024 * 1024,
        ),
    )(embedded, c0, h0, wih_e, wih_c, whh, b_ih, b_hh,
      wout_e, wout_h, wout_c, b_out)

    return pred[:B], h_new[:B][None]


# --------------------------------------------------------------------------
# Parameter init (matches nn.Embedding / nn.GRU(2D, D) / nn.Linear(3D, V) shapes)
# --------------------------------------------------------------------------

def init_params(key, d_model, output_size):
    D, V = d_model, output_size
    ks = jax.random.split(key, 8)
    k_gru = 1.0 / math.sqrt(D)
    k_fc = 1.0 / math.sqrt(3 * D)

    def u(k, shape, scale):
        return jax.random.uniform(k, shape, jnp.float32, -scale, scale)

    return {
        "d_model": D,
        "output_size": V,
        "embedding": jax.random.normal(ks[0], (V, D), jnp.float32),
        # GRU(input_size=2D, hidden_size=D), gate order [r | z | n]
        "w_ih": u(ks[1], (3 * D, 2 * D), k_gru),
        "w_hh": u(ks[2], (3 * D, D), k_gru),
        "b_ih": u(ks[3], (3 * D,), k_gru),
        "b_hh": u(ks[4], (3 * D,), k_gru),
        # fc_out: Linear(3D, V)
        "w_out": u(ks[5], (V, 3 * D), k_fc),
        "b_out": u(ks[6], (V,), k_fc),
    }


# --------------------------------------------------------------------------
# Pure-JAX reference (for correctness assert)
# --------------------------------------------------------------------------

def _ref_decoder_step(params, input_ids, hidden, context):
    D = params["d_model"]
    e = jnp.take(params["embedding"], input_ids, axis=0)
    h = hidden[0]
    c = context[0]
    x = jnp.concatenate([e, c], axis=1)                    # emb_con
    gi = x @ params["w_ih"].T + params["b_ih"]
    gh = h @ params["w_hh"].T + params["b_hh"]
    r = jax.nn.sigmoid(gi[:, :D] + gh[:, :D])
    z = jax.nn.sigmoid(gi[:, D:2 * D] + gh[:, D:2 * D])
    n = jnp.tanh(gi[:, 2 * D:] + r * gh[:, 2 * D:])
    h_new = (1.0 - z) * n + z * h
    out = jnp.concatenate([e, h_new, c], axis=1)
    pred = out @ params["w_out"].T + params["b_out"]
    return pred, h_new[None]


# --------------------------------------------------------------------------

if __name__ == "__main__":
    B, d_model, output_size = 2, 32, 50

    key = jax.random.PRNGKey(0)
    kp, ki, kh, kc = jax.random.split(key, 4)

    params = init_params(kp, d_model, output_size)
    input_ids = jax.random.randint(ki, (B,), 0, output_size, dtype=jnp.int32)
    hidden = jax.random.normal(kh, (1, B, d_model), jnp.float32)
    context = jax.random.normal(kc, (1, B, d_model), jnp.float32)

    pred, h_new = decoder_rnn_step(params, input_ids, hidden, context)
    pred = jax.block_until_ready(pred)
    h_new = jax.block_until_ready(h_new)

    ref_pred, ref_h = _ref_decoder_step(params, input_ids, hidden, context)
    assert pred.shape == (B, output_size)
    assert h_new.shape == (1, B, d_model)
    assert jnp.allclose(pred, ref_pred, atol=1e-4, rtol=1e-4), "prediction mismatch"
    assert jnp.allclose(h_new, ref_h, atol=1e-4, rtol=1e-4), "hidden mismatch"

    print("KERNEL_OK")
</pallas_src>

<mosaic_0001>
module attributes {stable_mosaic.version = 11 : i64} {
  func.func @_decoder_step_kernel(%arg0: i32, %arg1: memref<2x32xf32, #tpu.memory_space<vmem>>, %arg2: memref<2x32xf32, #tpu.memory_space<vmem>>, %arg3: memref<2x32xf32, #tpu.memory_space<vmem>>, %arg4: memref<32x96xf32, #tpu.memory_space<vmem>>, %arg5: memref<32x96xf32, #tpu.memory_space<vmem>>, %arg6: memref<32x96xf32, #tpu.memory_space<vmem>>, %arg7: memref<1x96xf32, #tpu.memory_space<vmem>>, %arg8: memref<1x96xf32, #tpu.memory_space<vmem>>, %arg9: memref<32x50xf32, #tpu.memory_space<vmem>>, %arg10: memref<32x50xf32, #tpu.memory_space<vmem>>, %arg11: memref<32x50xf32, #tpu.memory_space<vmem>>, %arg12: memref<1x50xf32, #tpu.memory_space<vmem>>, %arg13: memref<2x50xf32, #tpu.memory_space<vmem>>, %arg14: memref<2x32xf32, #tpu.memory_space<vmem>>) attributes {dimension_semantics = [#tpu.dimension_semantics<parallel>], iteration_bounds = array<i64: 1>, scalar_prefetch = 0 : i64, scratch_operands = 0 : i64, tpu.core_type = #tpu.core_type<tc>, window_params = [{transform_indices = @transform_0, window_bounds = array<i64: 2, 32>}, {transform_indices = @transform_1, window_bounds = array<i64: 2, 32>}, {transform_indices = @transform_2, window_bounds = array<i64: 2, 32>}, {pipeline_mode = #tpu.pipeline_mode<synchronous>, transform_indices = @transform_3, window_bounds = array<i64: 32, 96>}, {pipeline_mode = #tpu.pipeline_mode<synchronous>, transform_indices = @transform_4, window_bounds = array<i64: 32, 96>}, {pipeline_mode = #tpu.pipeline_mode<synchronous>, transform_indices = @transform_5, window_bounds = array<i64: 32, 96>}, {pipeline_mode = #tpu.pipeline_mode<synchronous>, transform_indices = @transform_6, window_bounds = array<i64: 1, 96>}, {pipeline_mode = #tpu.pipeline_mode<synchronous>, transform_indices = @transform_7, window_bounds = array<i64: 1, 96>}, {pipeline_mode = #tpu.pipeline_mode<synchronous>, transform_indices = @transform_8, window_bounds = array<i64: 32, 50>}, {pipeline_mode = #tpu.pipeline_mode<synchronous>, transform_indices = @transform_9, window_bounds = array<i64: 32, 50>}, {pipeline_mode = #tpu.pipeline_mode<synchronous>, transform_indices = @transform_10, window_bounds = array<i64: 32, 50>}, {pipeline_mode = #tpu.pipeline_mode<synchronous>, transform_indices = @transform_11, window_bounds = array<i64: 1, 50>}, {transform_indices = @transform_12, window_bounds = array<i64: 2, 50>}, {transform_indices = @transform_13, window_bounds = array<i64: 2, 32>}]} {
    %c0 = arith.constant 0 : index
    %c0_0 = arith.constant 0 : index
    %0 = vector.load %arg1[%c0, %c0_0] : memref<2x32xf32, #tpu.memory_space<vmem>>, vector<2x32xf32>
    %c0_1 = arith.constant 0 : index
    %c0_2 = arith.constant 0 : index
    %1 = vector.load %arg2[%c0_1, %c0_2] : memref<2x32xf32, #tpu.memory_space<vmem>>, vector<2x32xf32>
    %c0_3 = arith.constant 0 : index
    %c0_4 = arith.constant 0 : index
    %2 = vector.load %arg3[%c0_3, %c0_4] : memref<2x32xf32, #tpu.memory_space<vmem>>, vector<2x32xf32>
    %c0_5 = arith.constant 0 : index
    %c0_6 = arith.constant 0 : index
    %3 = vector.load %arg4[%c0_5, %c0_6] : memref<32x96xf32, #tpu.memory_space<vmem>>, vector<32x96xf32>
    %cst = arith.constant dense<0.000000e+00> : vector<2x96xf32>
    %4 = tpu.matmul %0, %3, %cst {dimension_numbers = #tpu.dot_dimension_numbers<[1], [0], [0], [1], [0, 0, 1, 1], [], []>} : vector<2x32xf32>, vector<32x96xf32>, vector<2x96xf32> -> vector<2x96xf32>
    %c0_7 = arith.constant 0 : index
    %c0_8 = arith.constant 0 : index
    %5 = vector.load %arg5[%c0_7, %c0_8] : memref<32x96xf32, #tpu.memory_space<vmem>>, vector<32x96xf32>
    %cst_9 = arith.constant dense<0.000000e+00> : vector<2x96xf32>
    %6 = tpu.matmul %1, %5, %cst_9 {dimension_numbers = #tpu.dot_dimension_numbers<[1], [0], [0], [1], [0, 0, 1, 1], [], []>} : vector<2x32xf32>, vector<32x96xf32>, vector<2x96xf32> -> vector<2x96xf32>
    %7 = arith.addf %4, %6 : vector<2x96xf32>
    %c0_10 = arith.constant 0 : index
    %c0_11 = arith.constant 0 : index
    %8 = vector.load %arg7[%c0_10, %c0_11] : memref<1x96xf32, #tpu.memory_space<vmem>>, vector<1x96xf32>
    %9 = vector.broadcast %8 : vector<1x96xf32> to vector<2x96xf32>
    %10 = arith.addf %7, %9 : vector<2x96xf32>
    %c0_12 = arith.constant 0 : index
    %c0_13 = arith.constant 0 : index
    %11 = vector.load %arg6[%c0_12, %c0_13] : memref<32x96xf32, #tpu.memory_space<vmem>>, vector<32x96xf32>
    %cst_14 = arith.constant dense<0.000000e+00> : vector<2x96xf32>
    %12 = tpu.matmul %2, %11, %cst_14 {dimension_numbers = #tpu.dot_dimension_numbers<[1], [0], [0], [1], [0, 0, 1, 1], [], []>} : vector<2x32xf32>, vector<32x96xf32>, vector<2x96xf32> -> vector<2x96xf32>
    %c0_15 = arith.constant 0 : index
    %c0_16 = arith.constant 0 : index
    %13 = vector.load %arg8[%c0_15, %c0_16] : memref<1x96xf32, #tpu.memory_space<vmem>>, vector<1x96xf32>
    %14 = vector.broadcast %13 : vector<1x96xf32> to vector<2x96xf32>
    %15 = arith.addf %12, %14 : vector<2x96xf32>
    %16 = vector.extract_strided_slice %10 {offsets = [0, 0], sizes = [2, 32], strides = [1, 1]} : vector<2x96xf32> to vector<2x32xf32>
    %17 = vector.extract_strided_slice %15 {offsets = [0, 0], sizes = [2, 32], strides = [1, 1]} : vector<2x96xf32> to vector<2x32xf32>
    %18 = arith.addf %16, %17 : vector<2x32xf32>
    %19 = arith.negf %18 : vector<2x32xf32>
    %20 = math.exp %19 : vector<2x32xf32>
    %cst_17 = arith.constant 1.000000e+00 : f32
    %21 = vector.broadcast %cst_17 : f32 to vector<2x32xf32>
    %22 = arith.addf %21, %20 : vector<2x32xf32>
    %23 = arith.divf %21, %22 : vector<2x32xf32>
    %24 = vector.extract_strided_slice %10 {offsets = [0, 32], sizes = [2, 32], strides = [1, 1]} : vector<2x96xf32> to vector<2x32xf32>
    %25 = vector.extract_strided_slice %15 {offsets = [0, 32], sizes = [2, 32], strides = [1, 1]} : vector<2x96xf32> to vector<2x32xf32>
    %26 = arith.addf %24, %25 : vector<2x32xf32>
    %27 = arith.negf %26 : vector<2x32xf32>
    %28 = math.exp %27 : vector<2x32xf32>
    %cst_18 = arith.constant 1.000000e+00 : f32
    %29 = vector.broadcast %cst_18 : f32 to vector<2x32xf32>
    %30 = arith.addf %29, %28 : vector<2x32xf32>
    %31 = arith.divf %29, %30 : vector<2x32xf32>
    %32 = vector.extract_strided_slice %10 {offsets = [0, 64], sizes = [2, 32], strides = [1, 1]} : vector<2x96xf32> to vector<2x32xf32>
    %33 = vector.extract_strided_slice %15 {offsets = [0, 64], sizes = [2, 32], strides = [1, 1]} : vector<2x96xf32> to vector<2x32xf32>
    %34 = arith.mulf %23, %33 : vector<2x32xf32>
    %35 = arith.addf %32, %34 : vector<2x32xf32>
    %36 = math.tanh %35 : vector<2x32xf32>
    %cst_19 = arith.constant 1.000000e+00 : f32
    %37 = vector.broadcast %cst_19 : f32 to vector<2x32xf32>
    %38 = arith.subf %37, %31 : vector<2x32xf32>
    %39 = arith.mulf %38, %36 : vector<2x32xf32>
    %40 = arith.mulf %31, %2 : vector<2x32xf32>
    %41 = arith.addf %39, %40 : vector<2x32xf32>
    %c0_20 = arith.constant 0 : index
    %c0_21 = arith.constant 0 : index
    %42 = vector.load %arg14[%c0_20, %c0_21] : memref<2x32xf32, #tpu.memory_space<vmem>>, vector<2x32xf32>
    tpu.vector_store %arg14[%c0_20, %c0_21], %41 {strides = array<i32>} : memref<2x32xf32, #tpu.memory_space<vmem>>, vector<2x32xf32>,
    %c0_22 = arith.constant 0 : index
    %c0_23 = arith.constant 0 : index
    %43 = vector.load %arg9[%c0_22, %c0_23] : memref<32x50xf32, #tpu.memory_space<vmem>>, vector<32x50xf32>
    %cst_24 = arith.constant dense<0.000000e+00> : vector<2x50xf32>
    %44 = tpu.matmul %0, %43, %cst_24 {dimension_numbers = #tpu.dot_dimension_numbers<[1], [0], [0], [1], [0, 0, 1, 1], [], []>} : vector<2x32xf32>, vector<32x50xf32>, vector<2x50xf32> -> vector<2x50xf32>
    %c0_25 = arith.constant 0 : index
    %c0_26 = arith.constant 0 : index
    %45 = vector.load %arg10[%c0_25, %c0_26] : memref<32x50xf32, #tpu.memory_space<vmem>>, vector<32x50xf32>
    %cst_27 = arith.constant dense<0.000000e+00> : vector<2x50xf32>
    %46 = tpu.matmul %41, %45, %cst_27 {dimension_numbers = #tpu.dot_dimension_numbers<[1], [0], [0], [1], [0, 0, 1, 1], [], []>} : vector<2x32xf32>, vector<32x50xf32>, vector<2x50xf32> -> vector<2x50xf32>
    %47 = arith.addf %44, %46 : vector<2x50xf32>
    %c0_28 = arith.constant 0 : index
    %c0_29 = arith.constant 0 : index
    %48 = vector.load %arg11[%c0_28, %c0_29] : memref<32x50xf32, #tpu.memory_space<vmem>>, vector<32x50xf32>
    %cst_30 = arith.constant dense<0.000000e+00> : vector<2x50xf32>
    %49 = tpu.matmul %1, %48, %cst_30 {dimension_numbers = #tpu.dot_dimension_numbers<[1], [0], [0], [1], [0, 0, 1, 1], [], []>} : vector<2x32xf32>, vector<32x50xf32>, vector<2x50xf32> -> vector<2x50xf32>
    %50 = arith.addf %47, %49 : vector<2x50xf32>
    %c0_31 = arith.constant 0 : index
    %c0_32 = arith.constant 0 : index
    %51 = vector.load %arg12[%c0_31, %c0_32] : memref<1x50xf32, #tpu.memory_space<vmem>>, vector<1x50xf32>
    %52 = vector.broadcast %51 : vector<1x50xf32> to vector<2x50xf32>
    %53 = arith.addf %50, %52 : vector<2x50xf32>
    %c0_33 = arith.constant 0 : index
    %c0_34 = arith.constant 0 : index
    %54 = vector.load %arg13[%c0_33, %c0_34] : memref<2x50xf32, #tpu.memory_space<vmem>>, vector<2x50xf32>
    tpu.vector_store %arg13[%c0_33, %c0_34], %53 {strides = array<i32>} : memref<2x50xf32, #tpu.memory_space<vmem>>, vector<2x50xf32>,
    return
  }
  func.func @transform_0(%arg0: i32) -> (i32, i32) {
    %c0_i32 = arith.constant 0 : i32
    %c0_i32_0 = arith.constant 0 : i32
    return %arg0, %c0_i32 : i32, i32
  }
  func.func @transform_1(%arg0: i32) -> (i32, i32) {
    %c0_i32 = arith.constant 0 : i32
    %c0_i32_0 = arith.constant 0 : i32
    return %arg0, %c0_i32 : i32, i32
  }
  func.func @transform_2(%arg0: i32) -> (i32, i32) {
    %c0_i32 = arith.constant 0 : i32
    %c0_i32_0 = arith.constant 0 : i32
    return %arg0, %c0_i32 : i32, i32
  }
  func.func @transform_3(%arg0: i32) -> (i32, i32) {
    %c0_i32 = arith.constant 0 : i32
    %c0_i32_0 = arith.constant 0 : i32
    %c0_i32_1 = arith.constant 0 : i32
    return %c0_i32, %c0_i32_0 : i32, i32
  }
  func.func @transform_4(%arg0: i32) -> (i32, i32) {
    %c0_i32 = arith.constant 0 : i32
    %c0_i32_0 = arith.constant 0 : i32
    %c0_i32_1 = arith.constant 0 : i32
    return %c0_i32, %c0_i32_0 : i32, i32
  }
  func.func @transform_5(%arg0: i32) -> (i32, i32) {
    %c0_i32 = arith.constant 0 : i32
    %c0_i32_0 = arith.constant 0 : i32
    %c0_i32_1 = arith.constant 0 : i32
    return %c0_i32, %c0_i32_0 : i32, i32
  }
  func.func @transform_6(%arg0: i32) -> (i32, i32) {
    %c0_i32 = arith.constant 0 : i32
    %c0_i32_0 = arith.constant 0 : i32
    %c0_i32_1 = arith.constant 0 : i32
    return %c0_i32, %c0_i32_0 : i32, i32
  }
  func.func @transform_7(%arg0: i32) -> (i32, i32) {
    %c0_i32 = arith.constant 0 : i32
    %c0_i32_0 = arith.constant 0 : i32
    %c0_i32_1 = arith.constant 0 : i32
    return %c0_i32, %c0_i32_0 : i32, i32
  }
  func.func @transform_8(%arg0: i32) -> (i32, i32) {
    %c0_i32 = arith.constant 0 : i32
    %c0_i32_0 = arith.constant 0 : i32
    %c0_i32_1 = arith.constant 0 : i32
    return %c0_i32, %c0_i32_0 : i32, i32
  }
  func.func @transform_9(%arg0: i32) -> (i32, i32) {
    %c0_i32 = arith.constant 0 : i32
    %c0_i32_0 = arith.constant 0 : i32
    %c0_i32_1 = arith.constant 0 : i32
    return %c0_i32, %c0_i32_0 : i32, i32
  }
  func.func @transform_10(%arg0: i32) -> (i32, i32) {
    %c0_i32 = arith.constant 0 : i32
    %c0_i32_0 = arith.constant 0 : i32
    %c0_i32_1 = arith.constant 0 : i32
    return %c0_i32, %c0_i32_0 : i32, i32
  }
  func.func @transform_11(%arg0: i32) -> (i32, i32) {
    %c0_i32 = arith.constant 0 : i32
    %c0_i32_0 = arith.constant 0 : i32
    %c0_i32_1 = arith.constant 0 : i32
    return %c0_i32, %c0_i32_0 : i32, i32
  }
  func.func @transform_12(%arg0: i32) -> (i32, i32) {
    %c0_i32 = arith.constant 0 : i32
    %c0_i32_0 = arith.constant 0 : i32
    return %arg0, %c0_i32 : i32, i32
  }
  func.func @transform_13(%arg0: i32) -> (i32, i32) {
    %c0_i32 = arith.constant 0 : i32
    %c0_i32_0 = arith.constant 0 : i32
    return %arg0, %c0_i32 : i32, i32
  }
}

</mosaic_0001>

<bundles_post_ra>
// kernel: tpu_custom_call.1
= control target key start
LH: loop header
LB: loop body
LE: loop exit
PB: predicated region body
PF: predicated region fallthrough
CT: control target
= control target key end

     0   :  { %19 = vsyncpa [#allocation3], 0  ;;  %s1243_s0 = inlined_call_operand.hbm [shape: f32[2,32], index: 0, kind: input, shape index: {}]   ;;  %s1244_s1 = inlined_call_operand.hbm [shape: f32[2,32], index: 1, kind: input, shape index: {}]   ;;  %s1245_s2 = inlined_call_operand.vmem [shape: f32[2,32], index: 2, kind: input, shape index: {}]   ;;  %s1246_s3 = inlined_call_operand.hbm [shape: f32[32,96], index: 3, kind: input, shape index: {}]   ;;  %s1247_s4 = inlined_call_operand.hbm [shape: f32[32,96], index: 4, kind: input, shape index: {}]   ;;  %s1248_s5 = inlined_call_operand.hbm [shape: f32[32,96], index: 5, kind: input, shape index: {}]   ;;  %s1249_s6 = inlined_call_operand.vmem [shape: f32[1,96], index: 6, kind: input, shape index: {}]   ;;  %s1250_s7 = inlined_call_operand.vmem [shape: f32[1,96], index: 7, kind: input, shape index: {}]   ;;  %s1251_s8 = inlined_call_operand.hbm [shape: f32[32,50], index: 8, kind: input, shape index: {}]   ;;  %s1252_s9 = inlined_call_operand.hbm [shape: f32[32,50], index: 9, kind: input, shape index: {}]   ;;  %s1253_s10 = inlined_call_operand.hbm [shape: f32[32,50], index: 10, kind: input, shape index: {}]   ;;  %s1254_s11 = inlined_call_operand.vmem [shape: f32[1,50], index: 11, kind: input, shape index: {}]   ;;  %s1255_s12 = inlined_call_operand.hbm [shape: f32[2,50], index: 12, kind: output, shape index: {0}]   ;;  %s1256_s13 = inlined_call_operand.hbm [shape: f32[2,32], index: 13, kind: output, shape index: {1}]  }
   0x1   :  { %20 = vsyncpa [#allocation6], 0 }
   0x2   :  { %21 = vsyncpa [#allocation9], 0 }
   0x3   :  { %22 = vsyncpa [#allocation12], 0 }
   0x4   :  { %23 = vsyncpa [#allocation15], 0 }
   0x5   :  { %24 = vsyncpa [#allocation4], 0 }
   0x6   :  { %25 = vsyncpa [#allocation18], 0  ;;  %s1046_s25 = smov [#allocation5]  }
   0x7   :  { %s42_s26 = sshll.u32 %s1046_s25, 4  ;;  %s43_s26 = int_to_ptr.vmem [resolvable:$true] %s42_s26 }
   0x8   :  { %s840_s27 = scalar_lea.vmem %s43_s26, 32  ;;  %p845_p1 = scmp.lt.s32.totalorder %s43_s26, %s43_s26 }
   0x9   :  { %p841_p0 = scmp.ne.s32.totalorder %s43_s26, %s840_s27  ;;  %p846_p2 = scmp.lt.s32.totalorder %s840_s27, %s840_s27 }
   0xb   :  { %p847_p3 = por %p846_p2, %p845_p1 }
   0xd   :  { %p848_p4 = pnand %p847_p3, %p841_p0 }
   0xf   :  { %851 = shalt.err (!%p848_p4)
}
  0x10   :  { %45 = dma.hbm_to_vmem [thread:$0]  %s1244_s1, 32, %s43_s26, [#allocation6]  }
  0x11   :  { %s1047_s30 = smov [#allocation8]   ;;  %s1048_s15 = smov [#allocation11]  }
  0x12   :  { %s65_s14 = sshll.u32 %s1047_s30, 4  ;;  %s93_s16 = sshll.u32 %s1048_s15, 4  ;;  %s66_s14 = int_to_ptr.vmem [resolvable:$true] %s65_s14  ;;  %s94_s16 = int_to_ptr.vmem [resolvable:$true] %s93_s16 }
  0x13   :  { %s860_s17 = scalar_lea.vmem %s66_s14, 512  ;;  %p865_p6 = scmp.lt.s32.totalorder %s66_s14, %s66_s14 }
  0x14   :  { %p861_p5 = scmp.ne.s32.totalorder %s66_s14, %s860_s17  ;;  %p866_p7 = scmp.lt.s32.totalorder %s860_s17, %s860_s17 }
  0x16   :  { %p867_p8 = por %p866_p7, %p865_p6 }
  0x18   :  { %p868_p9 = pnand %p867_p8, %p861_p5 }
  0x1a   :  { %871 = shalt.err (!%p868_p9)
}
  0x1b   :  { %s1049_s18 = smov 128   ;;  %s1050_s19 = smov 8  }
  0x1c   :  { %71 = dma.hbm_to_vmem [thread:$0]  %s1247_s4, 512, %s66_s14, [#allocation9], %s1049_s18, %s1049_s18, %s1050_s19  }
  0x1d   :  { %s880_s1 = scalar_lea.vmem %s94_s16, 512  ;;  %p885_p11 = scmp.lt.s32.totalorder %s94_s16, %s94_s16 }
  0x1e   :  { %p881_p10 = scmp.ne.s32.totalorder %s94_s16, %s880_s1  ;;  %p886_p12 = scmp.lt.s32.totalorder %s880_s1, %s880_s1 }
  0x20   :  { %p887_p13 = por %p886_p12, %p885_p11 }
  0x22   :  { %p888_p0 = pnand %p887_p13, %p881_p10 }
  0x24   :  { %891 = shalt.err (!%p888_p0)
}
  0x25   :  { %99 = dma.hbm_to_vmem [thread:$0]  %s1251_s8, 512, %s94_s16, [#allocation12], %s1049_s18, %s1049_s18, %s1050_s19  }
  0x26   :  { %s1051_s24 = smov [#allocation2]   ;;  %s1052_s26 = smov [#allocation7]  }
  0x27   :  { %s32_s25 = sshll.u32 %s1051_s24, 4  ;;  %s53_s4 = sshll.u32 %s1052_s26, 4  ;;  %s33_s25 = int_to_ptr.vmem [resolvable:$true] %s32_s25  ;;  %s54_s4 = int_to_ptr.vmem [resolvable:$true] %s53_s4 }
  0x28   :  { %s900_s27 = scalar_lea.vmem %s33_s25, 32  ;;  %p905_p2 = scmp.lt.s32.totalorder %s33_s25, %s33_s25 }
  0x29   :  { %p901_p1 = scmp.ne.s32.totalorder %s33_s25, %s900_s27  ;;  %p906_p3 = scmp.lt.s32.totalorder %s900_s27, %s900_s27 }
  0x2b   :  { %p907_p4 = por %p906_p3, %p905_p2 }
  0x2d   :  { %p908_p5 = pnand %p907_p4, %p901_p1 }
  0x2f   :  { %911 = shalt.err (!%p908_p5)
}
  0x30   :  { %35 = dma.hbm_to_vmem [thread:$0]  %s1243_s0, 32, %s33_s25, [#allocation3]  }
  0x31   :  { %s920_s30 = scalar_lea.vmem %s54_s4, 512  ;;  %p925_p7 = scmp.lt.s32.totalorder %s54_s4, %s54_s4 }
  0x32   :  { %p921_p6 = scmp.ne.s32.totalorder %s54_s4, %s920_s30  ;;  %p926_p8 = scmp.lt.s32.totalorder %s920_s30, %s920_s30 }
  0x34   :  { %p927_p9 = por %p926_p8, %p925_p7 }
  0x36   :  { %p928_p10 = pnand %p927_p9, %p921_p6 }
  0x38   :  { %931 = shalt.err (!%p928_p10)
}
  0x39   :  { %59 = dma.hbm_to_vmem [thread:$0]  %s1246_s3, 512, %s54_s4, [#allocation6], %s1049_s18, %s1049_s18, %s1050_s19  }
  0x3a   :  { %s1053_s15 = smov [#allocation10]   ;;  %s1054_s17 = smov [#allocation13]  }
  0x3b   :  { %s77_s16 = sshll.u32 %s1053_s15, 4  ;;  %s105_s0 = sshll.u32 %s1054_s17, 4  ;;  %s78_s16 = int_to_ptr.vmem [resolvable:$true] %s77_s16  ;;  %s106_s0 = int_to_ptr.vmem [resolvable:$true] %s105_s0 }
  0x3c   :  { %s940_s20 = scalar_lea.vmem %s78_s16, 512  ;;  %p945_p12 = scmp.lt.s32.totalorder %s78_s16, %s78_s16 }
  0x3d   :  { %p941_p11 = scmp.ne.s32.totalorder %s78_s16, %s940_s20  ;;  %p946_p13 = scmp.lt.s32.totalorder %s940_s20, %s940_s20 }
  0x3f   :  { %p947_p0 = por %p946_p13, %p945_p12 }
  0x41   :  { %p948_p1 = pnand %p947_p0, %p941_p11 }
  0x43   :  { %951 = shalt.err (!%p948_p1)
}
  0x44   :  { %83 = dma.hbm_to_vmem [thread:$0]  %s1248_s5, 512, %s78_s16, [#allocation9], %s1049_s18, %s1049_s18, %s1050_s19  }
  0x45   :  { %s960_s3 = scalar_lea.vmem %s106_s0, 512  ;;  %p965_p3 = scmp.lt.s32.totalorder %s106_s0, %s106_s0 }
  0x46   :  { %p961_p2 = scmp.ne.s32.totalorder %s106_s0, %s960_s3  ;;  %p966_p4 = scmp.lt.s32.totalorder %s960_s3, %s960_s3 }
  0x48   :  { %p967_p5 = por %p966_p4, %p965_p3 }
  0x4a   :  { %p968_p6 = pnand %p967_p5, %p961_p2 }
  0x4c   :  { %971 = shalt.err (!%p968_p6)
}
  0x4d   :  { %111 = dma.hbm_to_vmem [thread:$0]  %s1252_s9, 512, %s106_s0, [#allocation12], %s1049_s18, %s1049_s18, %s1050_s19  }
  0x4e   :  { %s1055_s24 = smov [#allocation14]  }
  0x4f   :  { %s117_s25 = sshll.u32 %s1055_s24, 4  ;;  %s118_s25 = int_to_ptr.vmem [resolvable:$true] %s117_s25 }
  0x50   :  { %s980_s26 = scalar_lea.vmem %s118_s25, 512  ;;  %p985_p8 = scmp.lt.s32.totalorder %s118_s25, %s118_s25 }
  0x51   :  { %p981_p7 = scmp.ne.s32.totalorder %s118_s25, %s980_s26  ;;  %p986_p9 = scmp.lt.s32.totalorder %s980_s26, %s980_s26 }
  0x53   :  { %p987_p10 = por %p986_p9, %p985_p8 }
  0x55   :  { %p988_p11 = pnand %p987_p10, %p981_p7 }
  0x57   :  { %991 = shalt.err (!%p988_p11)
}
  0x58   :  { %123 = dma.hbm_to_vmem [thread:$0]  %s1253_s10, 512, %s118_s25, [#allocation15], %s1049_s18, %s1049_s18, %s1050_s19  }
  0x59   :  { %1032 = dma.done.wait [#allocation3], 32  }
  0x5a   :  { %1033 = vsyncadd [#allocation3], 4294967264 }
  0x5b   :  { %1034 = dma.done.wait [#allocation6], 544  }
  0x5c   :  { %1035 = vsyncadd [#allocation6], 4294966752 }
  0x5d   :  { %1036 = dma.done.wait [#allocation9], 1024  }
  0x5e   :  { %1037 = vsyncadd [#allocation9], 4294966272 }
  0x5f   :  { %1038 = dma.done.wait [#allocation12], 1024  }
  0x60   :  { %1039 = vsyncadd [#allocation12], 4294966272 }
  0x61   :  { %1040 = dma.done.wait [#allocation15], 512  }
  0x62   :  { %1041 = vsyncadd [#allocation15], 4294966784  ;;  %v1056_v0 = vmov 0.0   ;;  %vm1057_vm0 = vmmov 0   ;;  %v160_v1 = vld [vmem:[#allocation8 + $0x18] sm:$0xff]  ;;  %v159_v3 = vld [vmem:[#allocation8 + $0x10] sm:$0xff] }
  0x63   :  { %743 = vmatprep.subr.mxu0 %v1056_v0  ;;  %754 = vmatprep.subr.mxu1 %v1056_v0  ;;  %v156_v2 = vld [vmem:[#allocation7 + $0x18] sm:$0xff]  ;;  %v155_v4 = vld [vmem:[#allocation7 + $0x10] sm:$0xff]  ;;  %v158_v5 = vld [vmem:[#allocation8 + $0x8] sm:$0xff]  ;;  %vm161_vm1 = vcmask 261120   ;;  %vm433_vm2 = vcmask 254976   ;;  %s1061_s29 = smov [#allocation17]  }
  0x64   :  { %751 = vmatprep.mubr.msk.f32.mxu0 %vm1057_vm0, %v1056_v0  ;;  %762 = vmatprep.mubr.msk.f32.mxu1 %vm1057_vm0, %v1056_v0  ;;  %v154_v6 = vld [vmem:[#allocation7 + $0x8] sm:$0xff]  ;;  %v157_v7 = vld [vmem:[#allocation8] sm:$0xff]  ;;  %v1185_v9 = vld [vmem:[#allocation5] sm:$0x3]  ;;  %s686_s30 = sshll.u32 %s1061_s29, 4  ;;  %s687_s30 = int_to_ptr.vmem [resolvable:$true] %s686_s30 }
  0x65   :  { %744 = vmatpush3.msra.mxu0 %v160_v1  ;;  %755 = vmatpush3.msra.mxu1 %v156_v2  ;;  %v153_v8 = vld [vmem:[#allocation7] sm:$0xff]  ;;  %v1189_v10 = vld [vmem:[#allocation2] sm:$0x3]  ;;  %v318_v12 = vld [vmem:[#allocation10 + $0x10] sm:$0xff]  ;;  %s992_s8 = scalar_lea.vmem %s687_s30, 32  ;;  %p997_p13 = scmp.lt.s32.totalorder %s687_s30, %s687_s30 }
  0x66   :  { %745 = vmatprep.subr.mxu0 %v1056_v0  ;;  %756 = vmatprep.subr.mxu1 %v1056_v0  ;;  %v319_v11 = vld [vmem:[#allocation10 + $0x18] sm:$0xff]  ;;  %v317_v13 = vld [vmem:[#allocation10 + $0x8] sm:$0xff]  ;;  %v316_v14 = vld [vmem:[#allocation10] sm:$0xff]  ;;  %p993_p12 = scmp.ne.s32.totalorder %s687_s30, %s992_s8  ;;  %p998_p0 = scmp.lt.s32.totalorder %s992_s8, %s992_s8 }
  0x67   :  { %746 = vmatpush3.msra.mxu0 %v159_v3  ;;  %757 = vmatpush3.msra.mxu1 %v155_v4  ;;  %v152_v15 = vld [vmem:[%s1245_s2] sm:$0x3]  ;;  %s1058_s2 = smov 64   ;;  %v441_v38 = vld [vmem:[#allocation13 + $0x10] sm:$0xff]  ;;  %v440_v40 = vld [vmem:[#allocation13 + $0x8] sm:$0xff] }
  0x68   :  { %747 = vmatprep.subr.mxu0 %v1056_v0  ;;  %758 = vmatprep.subr.mxu1 %v1056_v0  ;;  %v706_v21 = vld [vmem:[%s1250_s7] ss:$0 sm:$0xff]  ;;  %v437_v39 = vld [vmem:[#allocation11 + $0x10] sm:$0xff]  ;;  %v436_v41 = vld [vmem:[#allocation11 + $0x8] sm:$0xff]  ;;  %s1060_s7 = smov 32   ;;  %p999_p1 = por %p998_p0, %p997_p13 }
  0x69   :  { %748 = vmatpush3.msra.mxu0 %v158_v5  ;;  %759 = vmatpush3.msra.mxu1 %v154_v6  ;;  %v705_v25 = vld [vmem:[%s1249_s6] ss:$0 sm:$0xff]  ;;  %v439_v43 = vld [vmem:[#allocation13] sm:$0xff]  ;;  %s1059_s6 = smov 96   ;;  %v587_v53 = vld [vmem:[#allocation14 + $0x10] sm:$0xff] }
  0x6a   :  { %749 = vmatprep.subr.mxu0 %v1056_v0  ;;  %760 = vmatprep.subr.mxu1 %v1056_v0  ;;  %v442_v36 = vld [vmem:[#allocation13 + $0x18] sm:$0xff]  ;;  %v435_v44 = vld [vmem:[#allocation11] sm:$0xff]  ;;  %v586_v54 = vld [vmem:[#allocation14 + $0x8] sm:$0xff]  ;;  %p1000_p2 = pnand %p999_p1, %p993_p12 }
  0x6b   :  { %750 = vmatpush3.msra.mxu0 %v157_v7  ;;  %761 = vmatpush3.msra.mxu1 %v153_v8  ;;  %v438_v37 = vld [vmem:[#allocation11 + $0x18] sm:$0xff]  ;;  %v585_v55 = vld [vmem:[#allocation14] sm:$0xff] }
  0x6c   :  { %752 = vmatmul.mubr.msk.f32.vlgmr.msra.gmra.mxu0 %vm161_vm1, %v1185_v9  ;;  %765 = vmatprep.subr.mxu0 %v1056_v0  ;;  %v588_v51 = vld [vmem:[#allocation14 + $0x18] sm:$0xff] }
  0x6d   :  { %763 = vmatmul.mubr.msk.f32.vlgmr.msra.gmra.mxu1 %vm161_vm1, %v1189_v10  ;;  %766 = vmatpush3.msra.mxu0 %v319_v11 }
  0x6e   :  { %767 = vmatprep.subr.mxu0 %v1056_v0  ;;  %773 = vmatprep.mubr.msk.f32.mxu0 %vm1057_vm0, %v1056_v0 }
  0x6f   :  { %768 = vmatpush3.msra.mxu0 %v318_v12  ;;  %776 = vmatprep.subr.mxu1 %v1056_v0 }
  0x70   :  { %769 = vmatprep.subr.mxu0 %v1056_v0  ;;  %784 = vmatprep.mubr.msk.f32.mxu1 %vm1057_vm0, %v1056_v0 }
  0x71   :  { %770 = vmatpush3.msra.mxu0 %v317_v13  ;;  %777 = vmatpush3.msra.mxu1 %v442_v36 }
  0x72   :  { %771 = vmatprep.subr.mxu0 %v1056_v0  ;;  %778 = vmatprep.subr.mxu1 %v1056_v0 }
  0x73   :  { %772 = vmatpush3.msra.mxu0 %v316_v14  ;;  %779 = vmatpush3.msra.mxu1 %v441_v38 }
  0x74   :  { %774 = vmatmul.mubr.msk.f32.vlgmr.msra.gmra.mxu0 %vm161_vm1, %v152_v15  ;;  %787 = vmatprep.subr.mxu0 %v1056_v0 }
  0x75   :  { %795 = vmatprep.mubr.msk.f32.mxu0 %vm1057_vm0, %v1056_v0  ;;  %788 = vmatpush3.msra.mxu0 %v438_v37 }
  0x76   :  { %789 = vmatprep.subr.mxu0 %v1056_v0  ;;  %780 = vmatprep.subr.mxu1 %v1056_v0 }
  0x77   :  { %790 = vmatpush3.msra.mxu0 %v437_v39  ;;  %781 = vmatpush3.msra.mxu1 %v440_v40 }
  0x78   :  { %791 = vmatprep.subr.mxu0 %v1056_v0  ;;  %782 = vmatprep.subr.mxu1 %v1056_v0 }
  0x79   :  { %792 = vmatpush3.msra.mxu0 %v436_v41  ;;  %783 = vmatpush3.msra.mxu1 %v439_v43 }
  0x7a   :  { %793 = vmatprep.subr.mxu0 %v1056_v0  ;;  %798 = vmatprep.subr.mxu1 %v1056_v0 }
  0x7b   :  { %794 = vmatpush3.msra.mxu0 %v435_v44 }
  0x7c   :  { %796 = vmatmul.mubr.msk.f32.vlgmr.msra.gmra.mxu0 %vm161_vm1, %v1189_v10 }
 0x12c   :  { %v231_v16 = vpop.f32.mrf.mxu0 }
 0x12d   :  { %v304_v17 = vpop.f32.mrf.mxu1 }
 0x12e   :  { %v305_v18 = vadd.f32 %v304_v17, %v231_v16  ;;  %v753_v19 = vpop.f32.mrf.mxu0 }
 0x12f   :  { %v764_v20 = vpop.f32.mrf.mxu1 }
 0x130   :  { %v315_v26 = vadd.f32 %v705_v25, %v305_v18 }
 0x134   :  { %v396_v22 = vpop.f32.mrf.mxu0 }
 0x135   :  { %v397_v23 = vadd.f32 %v706_v21, %v396_v22 }
 0x136   :  { %v775_v24 = vpop.f32.mrf.mxu0 }
 0x137   :  { %408 = vrot.lane.b32.xlu0 %v397_v23, %s1058_s2  ;;  %v400_v27 = vadd.f32 %v397_v23, %v315_v26 }
 0x139   :  { %v708_v28 = vmul.f32 -1.442695, %v400_v27 }
 0x13b   :  { %826 = vpow2.f32 %v708_v28 }
 0x13c   :  { %v581_v56 = vpop.f32.mrf.mxu0 }
 0x13e   :  { %v797_v57 = vpop.f32.mrf.mxu0 }
 0x148   :  { %v827_v29 = vpop.eup %826 }
 0x149   :  { %v404_v30 = vadd.f32 1.0, %v827_v29 }
 0x14b   :  { %828 = vrcp.f32 %v404_v30 }
 0x158   :  { %v829_v31 = vpop.eup %828 }
 0x159   :  { %v418_v46 = vsub.f32 1.0, %v829_v31 }
 0x1a9   :  { %v409_v32 = vpop.permute.xlu0 %408 }
 0x1aa   :  { %v411_v33 = vmul.f32 %v829_v31, %v409_v32 }
 0x1ac   :  { %413 = vrot.lane.b32.xlu0 %v411_v33, %s1058_s2 }
 0x21e   :  { %v414_v34 = vpop.permute.xlu0 %413 }
 0x21f   :  { %v416_v35 = vadd.f32 %v414_v34, %v315_v26 }
 0x221   :  { %830 = vtanh.f32 %v416_v35 }
 0x22e   :  { %v831_v42 = vpop.eup %830 }
 0x22f   :  { %420 = vrot.lane.b32.xlu1 %v831_v42, %s1059_s6 }
 0x233   :  { %424 = vrot.lane.b32.xlu1 %v152_v15, %s1060_s7 }
 0x2a1   :  { %v421_v45 = vpop.permute.xlu1 %420 }
 0x2a2   :  { %v423_v48 = vmul.f32 %v421_v45, %v418_v46 }
 0x2a5   :  { %v425_v47 = vpop.permute.xlu1 %424 }
 0x2a6   :  { %v427_v49 = vmul.f32 %v829_v31, %v425_v47 }
 0x2a8   :  { %v428_v50 = vadd.f32 %v427_v49, %v423_v48 }
 0x2aa   :  { %430 = vrot.lane.b32.xlu0 %v428_v50, %s1059_s6 }
 0x31c   :  { %v431_v52 = vpop.permute.xlu0 %430 }
 0x31d   :  { %785 = vmatmul.mubr.msk.f32.vlgmr.msra.gmra.mxu1 %vm161_vm1, %v431_v52  ;;  %434 = vst.msk [vmem:[#allocation17] sm:$0x3] %vm433_vm2, %v431_v52 }
 0x31e   :  { %799 = vmatpush3.msra.mxu1 %v588_v51  ;;  %806 = vmatprep.mubr.msk.f32.mxu1 %vm1057_vm0, %v1056_v0 }
 0x31f   :  { %800 = vmatprep.subr.mxu1 %v1056_v0 }
 0x320   :  { %801 = vmatpush3.msra.mxu1 %v587_v53 }
 0x321   :  { %802 = vmatprep.subr.mxu1 %v1056_v0 }
 0x322   :  { %803 = vmatpush3.msra.mxu1 %v586_v54 }
 0x323   :  { %804 = vmatprep.subr.mxu1 %v1056_v0 }
 0x324   :  { %805 = vmatpush3.msra.mxu1 %v585_v55 }
 0x325   :  { %807 = vmatmul.mubr.msk.f32.vlgmr.msra.gmra.mxu1 %vm161_vm1, %v1185_v9 }
 0x326   :  { %1003 = shalt.err (!%p1000_p2)
}
 0x327   :  { %689 = dma.vmem_to_hbm [thread:$0]  %s687_s30, 32, %s1256_s13, [#allocation18]   ;;  %v712_v62 = vld [vmem:[%s1254_s11] ss:$0 sm:$0xff]  ;;  %vm668_vm3 = vcmask 402432  }
 0x328   :  { %s1062_s0 = smov [#allocation16]  }
 0x329   :  { %s676_s20 = sshll.u32 %s1062_s0, 4  ;;  %s677_s20 = int_to_ptr.vmem [resolvable:$true] %s676_s20 }
 0x32a   :  { %s1012_s21 = scalar_lea.vmem %s677_s20, 32  ;;  %p1017_p4 = scmp.lt.s32.totalorder %s677_s20, %s677_s20 }
 0x32b   :  { %p1013_p3 = scmp.ne.s32.totalorder %s677_s20, %s1012_s21  ;;  %p1018_p5 = scmp.lt.s32.totalorder %s1012_s21, %s1012_s21 }
 0x32d   :  { %p1019_p6 = por %p1018_p5, %p1017_p4 }
 0x32f   :  { %p1020_p7 = pnand %p1019_p6, %p1013_p3 }
 0x3dd   :  { %v511_v58 = vpop.f32.mrf.mxu1 }
 0x3de   :  { %v582_v60 = vadd.f32 %v581_v56, %v511_v58 }
 0x3df   :  { %v786_v59 = vpop.f32.mrf.mxu1 }
 0x3e5   :  { %v655_v61 = vpop.f32.mrf.mxu1 }
 0x3e6   :  { %v659_v63 = vadd.f32 %v655_v61, %v582_v60 }
 0x3e7   :  { %v808_v0 = vpop.f32.mrf.mxu1 }
 0x3e8   :  { %v667_v1 = vadd.f32 %v712_v62, %v659_v63 }
 0x3ea   :  { %669 = vst.msk [vmem:[#allocation16] sm:$0x3] %vm668_vm3, %v667_v1 }
 0x3eb   :  { %1023 = shalt.err (!%p1020_p7)
}
 0x3ec   :  { %679 = dma.vmem_to_hbm [thread:$0]  %s677_s20, 32, %s1255_s12, [#allocation4]  }
 0x3ed   :  { %1042 = dma.done.wait [#allocation4], 32  }
 0x3ee   :  { %1043 = vsyncadd [#allocation4], 4294967264 }
 0x3ef   :  { %1044 = dma.done.wait [#allocation18], 32  }
 0x3f0   :  { %1045 = vsyncadd [#allocation18], 4294967264 }
 0x3f1   :  { %696 = vsyncpa [#allocation3], 1 }
 0x3f2   :  { %697 = vsyncpa [#allocation6], 1 }
 0x3f3   :  { %698 = vsyncpa [#allocation9], 1 }
 0x3f4   :  { %699 = vsyncpa [#allocation12], 1 }
 0x3f5   :  { %700 = vsyncpa [#allocation15], 1 }
 0x3f6   :  { %701 = vsyncpa [#allocation4], 1 }
 0x3f7   :  { %702 = vsyncpa [#allocation18], 1 }

</bundles_post_ra>
